<compile_context>
chip_gen: v7x
topology: tpu7x:2x2x1
jax: 0.10.0
libtpu: 0.0.40
codegen_flags: <defaults>
</compile_context>

<pallas_src>
import jax
import jax.numpy as jnp
from jax.experimental import pallas as pl
from jax.experimental.pallas import tpu as pltpu


def critic_kernel(xt_ref, w1t_ref, w2t_ref, aux_ref, o_ref):
    """One lane-tile (batch chunk) of the fused 3-layer MLP, batch-on-lanes.

    xt_ref  : (S, TB)  bf16   state tile, transposed (batch along lanes)
    w1t_ref : (W, S)   bf16   c1 weight transposed; VMEM-resident across grid
    w2t_ref : (W, W)   bf16   c2 weight transposed; VMEM-resident across grid
    aux_ref : (W, 4)   f32    col0 = b1, col1 = b2, col2 = w3, aux[0,3] = b3
    o_ref   : (1, TB)  f32    lane-dense output row for this tile
    """
    xt = xt_ref[...]                       # (S, TB) bf16
    b1 = aux_ref[:, 0:1]                   # (W, 1) f32
    b2 = aux_ref[:, 1:2]                   # (W, 1) f32
    w3 = aux_ref[:, 2:3]                   # (W, 1) f32
    b3 = aux_ref[0:1, 3:4]                 # (1, 1) f32

    # c1 + relu: (W,S) x (S,TB) on the MXU, bf16 operands, f32 accumulation.
    h1 = jnp.maximum(
        jnp.dot(w1t_ref[...], xt, preferred_element_type=jnp.float32) + b1, 0.0)

    # dropout(p=0.1): eval-mode identity.
    # TODO(synk): training-mode dropout would need pltpu.prng_seed +
    # pltpu.stateful_bernoulli; PyTorch eval-mode dropout is identity, so skip.

    # c2 + relu: (W,W) x (W,TB) on the MXU (h1 cast to bf16 only at the dot).
    h2 = jnp.maximum(
        jnp.dot(w2t_ref[...], h1.astype(jnp.bfloat16),
                preferred_element_type=jnp.float32) + b2, 0.0)

    # c3: VPU multiply + sublane reduction over W -> already lane-dense (1, TB).
    v = jnp.sum(h2 * w3, axis=0, keepdims=True) + b3
    o_ref[...] = v.astype(o_ref.dtype)


def critic_forward(state, packed):
    """state: (B, S) or (S,). packed: dict with 'w1t' (W,S), 'w2t' (W,W),
    'aux' (W,4). Returns (B, 1) float32 values (matches nn.Linear(net_width, 1))."""
    if state.ndim == 1:                    # mirrors state.unsqueeze(0)
        state = state[None, :]
    state = state.astype(jnp.float32)
    B, S = state.shape

    w1t, w2t, aux = packed["w1t"], packed["w2t"], packed["aux"]
    W = w1t.shape[0]
    assert w1t.shape == (W, S), (w1t.shape, S)
    assert w2t.shape == (W, W), w2t.shape
    assert aux.shape == (W, 4), aux.shape

    # Lane-tile size: multiple of 128 lanes, capped at 512.  The kernel is
    # overhead-bound, so prefer one fat grid step; x tile at TB=512 is ~32 KB.
    TB = min(512, ((B + 127) // 128) * 128)
    num_tiles = pl.cdiv(B, TB)
    B_pad = num_tiles * TB

    # Batch -> lane axis; bf16 halves the only O(B) HBM traffic.
    xt = state.T.astype(jnp.bfloat16)      # (S, B)
    if B_pad != B:
        xt = jnp.pad(xt, ((0, 0), (0, B_pad - B)))

    out = pl.pallas_call(
        critic_kernel,
        out_shape=jax.ShapeDtypeStruct((1, B_pad), jnp.float32),
        grid=(num_tiles,),
        in_specs=[
            pl.BlockSpec((S, TB), lambda i: (0, i)),   # x: tiled along lanes
            pl.BlockSpec((W, S), lambda i: (0, 0)),    # w1^T: resident
            pl.BlockSpec((W, W), lambda i: (0, 0)),    # w2^T: resident
            pl.BlockSpec((W, 4), lambda i: (0, 0)),    # b1 | b2 | w3 | b3
        ],
        out_specs=pl.BlockSpec((1, TB), lambda i: (0, i)),  # lane-dense row
        compiler_params=pltpu.CompilerParams(
            dimension_semantics=("parallel",)),        # v7x: 2 TCs
    )(xt, w1t, w2t, aux)

    return out[0, :B][:, None]             # (B, 1)


def init_linear_params(key, state_dim, net_width):
    """Deterministic init matching nn.Linear parameter shapes.
    Weights stored transposed (in_features, out_features)."""
    ks = jax.random.split(key, 6)

    def linear(kw, kb, fan_in, fan_out):
        bound = 1.0 / jnp.sqrt(float(fan_in))
        w = jax.random.uniform(kw, (fan_in, fan_out), jnp.float32, -bound, bound)
        b = jax.random.uniform(kb, (fan_out,), jnp.float32, -bound, bound)
        return w, b

    w1, b1 = linear(ks[0], ks[1], state_dim, net_width)
    w2, b2 = linear(ks[2], ks[3], net_width, net_width)
    w3, b3 = linear(ks[4], ks[5], net_width, 1)
    return {"w1": w1, "b1": b1, "w2": w2, "b2": b2, "w3": w3, "b3": b3}


def pack_params(raw):
    """Pack for the batch-on-lanes kernel (done once, outside the hot path):
    transposed bf16 matmul weights + one f32 aux array for biases / w3 / b3."""
    S, W = raw["w1"].shape
    w1t = raw["w1"].T.astype(jnp.bfloat16)          # (W, S)
    w2t = raw["w2"].T.astype(jnp.bfloat16)          # (W, W)
    aux = jnp.zeros((W, 4), jnp.float32)
    aux = aux.at[:, 0].set(raw["b1"].reshape(-1))
    aux = aux.at[:, 1].set(raw["b2"].reshape(-1))
    aux = aux.at[:, 2].set(raw["w3"].reshape(-1))   # w3 as a column
    aux = aux.at[0, 3].set(raw["b3"].reshape(-1)[0])
    return {"w1t": w1t, "w2t": w2t, "aux": aux}


def _reference(state, raw, mxu_dtype=jnp.float32):
    """Pure-JAX reference.  mxu_dtype=bfloat16 reproduces the kernel's MXU
    operand precision (f32 accumulation and f32 elementwise either way)."""
    if state.ndim == 1:
        state = state[None, :]
    h1 = jnp.maximum(
        jnp.dot(state.astype(mxu_dtype), raw["w1"].astype(mxu_dtype),
                preferred_element_type=jnp.float32) + raw["b1"][None, :], 0.0)
    h2 = jnp.maximum(
        jnp.dot(h1.astype(mxu_dtype), raw["w2"].astype(mxu_dtype),
                preferred_element_type=jnp.float32) + raw["b2"][None, :], 0.0)
    return jnp.dot(h2, raw["w3"]) + raw["b3"][None, :]


if __name__ == "__main__":
    state_dim = 32
    net_width = 64
    batch = 8

    key = jax.random.PRNGKey(0)
    k_params, k_state, k_big = jax.random.split(key, 3)
    raw = init_linear_params(k_params, state_dim, net_width)
    packed = pack_params(raw)

    def check(x, tag):
        v = jax.block_until_ready(critic_forward(x, packed))
        x2 = x if x.ndim == 2 else x[None, :]
        assert v.shape == (x2.shape[0], 1), (tag, v.shape)
        # Tight check vs a reference using the same bf16 MXU-operand numerics.
        ref_mxu = _reference(x2, raw, mxu_dtype=jnp.bfloat16)
        assert jnp.allclose(v, ref_mxu, atol=2e-3, rtol=2e-3), (
            f"{tag}: mismatch vs bf16-MXU reference")
        # Loose semantic check vs the pure-f32 PyTorch-equivalent math.
        ref_f32 = _reference(x2, raw, mxu_dtype=jnp.float32)
        assert jnp.allclose(v, ref_f32, atol=1e-1, rtol=1e-1), (
            f"{tag}: mismatch vs f32 reference")
        return v

    # small batch: single 128-lane tile (padded 8 -> 128)
    state = jax.random.normal(k_state, (batch, state_dim), jnp.float32)
    check(state, "small batch")

    # 1-D input path (state.dim() == 1 branch)
    check(state[0], "1-D input")

    # larger batch: exercises the lane grid (3 tiles of 512) + padding path
    big = jax.random.normal(k_big, (1300, state_dim), jnp.float32)
    check(big, "big batch")

    print("KERNEL_OK")
</pallas_src>

<mosaic_0001>
module attributes {stable_mosaic.version = 11 : i64} {
  func.func @critic_kernel(%arg0: i32, %arg1: memref<32x128xbf16, #tpu.memory_space<vmem>>, %arg2: memref<64x32xbf16, #tpu.memory_space<vmem>>, %arg3: memref<64x64xbf16, #tpu.memory_space<vmem>>, %arg4: memref<64x4xf32, #tpu.memory_space<vmem>>, %arg5: memref<1x128xf32, #tpu.memory_space<vmem>>) attributes {dimension_semantics = [#tpu.dimension_semantics<parallel>], iteration_bounds = array<i64: 1>, scalar_prefetch = 0 : i64, scratch_operands = 0 : i64, tpu.core_type = #tpu.core_type<tc>, window_params = [{transform_indices = @transform_0, window_bounds = array<i64: 32, 128>}, {pipeline_mode = #tpu.pipeline_mode<synchronous>, transform_indices = @transform_1, window_bounds = array<i64: 64, 32>}, {pipeline_mode = #tpu.pipeline_mode<synchronous>, transform_indices = @transform_2, window_bounds = array<i64: 64, 64>}, {pipeline_mode = #tpu.pipeline_mode<synchronous>, transform_indices = @transform_3, window_bounds = array<i64: 64, 4>}, {transform_indices = @transform_4, window_bounds = array<i64: 1, 128>}]} {
    %c0 = arith.constant 0 : index
    %c0_0 = arith.constant 0 : index
    %0 = vector.load %arg1[%c0, %c0_0] : memref<32x128xbf16, #tpu.memory_space<vmem>>, vector<32x128xbf16>
    %c0_1 = arith.constant 0 : index
    %c0_2 = arith.constant 0 : index
    %1 = vector.load %arg4[%c0_1, %c0_2] : memref<64x4xf32, #tpu.memory_space<vmem>>, vector<64x1xf32>
    %c0_3 = arith.constant 0 : index
    %c1 = arith.constant 1 : index
    %2 = vector.load %arg4[%c0_3, %c1] : memref<64x4xf32, #tpu.memory_space<vmem>>, vector<64x1xf32>
    %c0_4 = arith.constant 0 : index
    %c2 = arith.constant 2 : index
    %3 = vector.load %arg4[%c0_4, %c2] : memref<64x4xf32, #tpu.memory_space<vmem>>, vector<64x1xf32>
    %c0_5 = arith.constant 0 : index
    %c3 = arith.constant 3 : index
    %4 = vector.load %arg4[%c0_5, %c3] : memref<64x4xf32, #tpu.memory_space<vmem>>, vector<1x1xf32>
    %c0_6 = arith.constant 0 : index
    %c0_7 = arith.constant 0 : index
    %5 = vector.load %arg2[%c0_6, %c0_7] : memref<64x32xbf16, #tpu.memory_space<vmem>>, vector<64x32xbf16>
    %cst = arith.constant dense<0.000000e+00> : vector<64x128xf32>
    %6 = tpu.matmul %5, %0, %cst {dimension_numbers = #tpu.dot_dimension_numbers<[1], [0], [0], [1], [0, 0, 1, 1], [], []>} : vector<64x32xbf16>, vector<32x128xbf16>, vector<64x128xf32> -> vector<64x128xf32>
    %7 = vector.broadcast %1 : vector<64x1xf32> to vector<64x128xf32>
    %8 = arith.addf %6, %7 : vector<64x128xf32>
    %cst_8 = arith.constant 0.000000e+00 : f32
    %9 = vector.broadcast %cst_8 : f32 to vector<64x128xf32>
    %10 = arith.maximumf %8, %9 : vector<64x128xf32>
    %c0_9 = arith.constant 0 : index
    %c0_10 = arith.constant 0 : index
    %11 = vector.load %arg3[%c0_9, %c0_10] : memref<64x64xbf16, #tpu.memory_space<vmem>>, vector<64x64xbf16>
    %12 = arith.truncf %10 : vector<64x128xf32> to vector<64x128xbf16>
    %cst_11 = arith.constant dense<0.000000e+00> : vector<64x128xf32>
    %13 = tpu.matmul %11, %12, %cst_11 {dimension_numbers = #tpu.dot_dimension_numbers<[1], [0], [0], [1], [0, 0, 1, 1], [], []>} : vector<64x64xbf16>, vector<64x128xbf16>, vector<64x128xf32> -> vector<64x128xf32>
    %14 = vector.broadcast %2 : vector<64x1xf32> to vector<64x128xf32>
    %15 = arith.addf %13, %14 : vector<64x128xf32>
    %cst_12 = arith.constant 0.000000e+00 : f32
    %16 = vector.broadcast %cst_12 : f32 to vector<64x128xf32>
    %17 = arith.maximumf %15, %16 : vector<64x128xf32>
    %18 = vector.broadcast %3 : vector<64x1xf32> to vector<64x128xf32>
    %19 = arith.mulf %17, %18 : vector<64x128xf32>
    %cst_13 = arith.constant dense<0.000000e+00> : vector<128xf32>
    %20 = vector.multi_reduction <add>, %19, %cst_13 [0] : vector<64x128xf32> to vector<128xf32>
    %21 = vector.shape_cast %20 : vector<128xf32> to vector<1x128xf32>
    %22 = vector.broadcast %4 : vector<1x1xf32> to vector<1x128xf32>
    %23 = arith.addf %21, %22 : vector<1x128xf32>
    %c0_14 = arith.constant 0 : index
    %c0_15 = arith.constant 0 : index
    %24 = vector.load %arg5[%c0_14, %c0_15] : memref<1x128xf32, #tpu.memory_space<vmem>>, vector<1x128xf32>
    tpu.vector_store %arg5[%c0_14, %c0_15], %23 {strides = array<i32>} : memref<1x128xf32, #tpu.memory_space<vmem>>, vector<1x128xf32>,
    return
  }
  func.func @transform_0(%arg0: i32) -> (i32, i32) {
    %c0_i32 = arith.constant 0 : i32
    %c0_i32_0 = arith.constant 0 : i32
    return %c0_i32, %arg0 : i32, i32
  }
  func.func @transform_1(%arg0: i32) -> (i32, i32) {
    %c0_i32 = arith.constant 0 : i32
    %c0_i32_0 = arith.constant 0 : i32
    %c0_i32_1 = arith.constant 0 : i32
    return %c0_i32, %c0_i32_0 : i32, i32
  }
  func.func @transform_2(%arg0: i32) -> (i32, i32) {
    %c0_i32 = arith.constant 0 : i32
    %c0_i32_0 = arith.constant 0 : i32
    %c0_i32_1 = arith.constant 0 : i32
    return %c0_i32, %c0_i32_0 : i32, i32
  }
  func.func @transform_3(%arg0: i32) -> (i32, i32) {
    %c0_i32 = arith.constant 0 : i32
    %c0_i32_0 = arith.constant 0 : i32
    %c0_i32_1 = arith.constant 0 : i32
    return %c0_i32, %c0_i32_0 : i32, i32
  }
  func.func @transform_4(%arg0: i32) -> (i32, i32) {
    %c0_i32 = arith.constant 0 : i32
    %c0_i32_0 = arith.constant 0 : i32
    return %c0_i32, %arg0 : i32, i32
  }
}

</mosaic_0001>

<bundles_post_ra>
// kernel: tpu_custom_call.1
= control target key start
LH: loop header
LB: loop body
LE: loop exit
PB: predicated region body
PF: predicated region fallthrough
CT: control target
= control target key end

     0   :  { %vm112_vm0 = vcmask 261120   ;;  %v533_v3 = vmov 0   ;;  %s640_s0 = inlined_call_operand.vmem [shape: bf16[32,128], index: 0, kind: input, shape index: {}]   ;;  %s641_s1 = inlined_call_operand.vmem [shape: bf16[64,32], index: 1, kind: input, shape index: {}]   ;;  %s642_s2 = inlined_call_operand.vmem [shape: bf16[64,64], index: 2, kind: input, shape index: {}]   ;;  %s643_s3 = inlined_call_operand.vmem [shape: f32[64,4], index: 3, kind: input, shape index: {}]   ;;  %s644_s4 = inlined_call_operand.hbm [shape: f32[1,128], index: 4, kind: output, shape index: {}]  }
   0x1   :  { %v499_v0 = vld [vmem:[%s640_s0] sm:$0xff]   ;;  %v500_v1 = vld [vmem:[%s640_s0 + $0x8] sm:$0xff]   ;;  %487 = vset.pattern.permute.xlu0 %v533_v3  ;;  %488 = vset.pattern.permute.xlu1 %v533_v3  ;;  %v25_v6 = vld [vmem:[%s643_s3 + $0x10] sm:$0xff] }
   0x2   :  { %454 = vmatprep.subr.bf16.mxu0 %v499_v0  ;;  %v501_v2 = vld [vmem:[%s641_s1] sm:$0xff]   ;;  %v502_v4 = vld [vmem:[%s641_s1 + $0x8] sm:$0xff]   ;;  %v503_v7 = vld [vmem:[%s641_s1 + $0x10] sm:$0xff]   ;;  %52 = vperm.xlu1 %488, %v25_v6  }
   0x3   :  { %455 = vmatpush3.bf16.msra.mxu0 %v499_v0  ;;  %458 = vmatprep.mubr.msk.bf16.mxu0 %vm112_vm0, %v501_v2  ;;  %v23_v5 = vld [vmem:[%s643_s3] sm:$0xff]  ;;  %v24_v8 = vld [vmem:[%s643_s3 + $0x8] sm:$0xff]  ;;  %v26_v9 = vld [vmem:[%s643_s3 + $0x18] sm:$0xff] }
   0x4   :  { %456 = vmatprep.subr.bf16.mxu0 %v500_v1  ;;  %42 = vperm.xlu0 %487, %v23_v5  }
   0x7   :  { %457 = vmatpush3.bf16.msra.mxu0 %v500_v1 }
   0x8   :  { %47 = vperm.xlu0 %487, %v24_v8  }
   0xa   :  { %459 = vmatmul.mubr.msk.bf16.vlgmr.msra.gmra.mrb[0].mxu0 %vm112_vm0, %v502_v4 }
   0xb   :  { %462 = vmatprep.mubr.msk.bf16.mxu0 %vm112_vm0, %v503_v7 }
   0xc   :  { %9 = vsyncpa [#allocation3], 0  ;;  %57 = vperm.xlu1 %488, %v26_v9   ;;  %v27_v10 = vld [vmem:[%s643_s3 + $0x20] sm:$0xff]  ;;  %v28_v11 = vld [vmem:[%s643_s3 + $0x28] sm:$0xff]  ;;  %vm262_vm1 = vcmask 523264   ;;  %v534_v16 = vmov 1  }
   0xd   :  { %v504_v12 = vld [vmem:[%s641_s1 + $0x18] sm:$0xff]   ;;  %62 = vperm.xlu0 %487, %v27_v10   ;;  %v29_v13 = vld [vmem:[%s643_s3 + $0x30] sm:$0xff]  ;;  %v505_v15 = vld [vmem:[%s642_s2] sm:$0xff]   ;;  %v535_v17 = vmov 2   ;;  %v536_v19 = vmov 3  }
   0xe   :  { %v30_v14 = vld [vmem:[%s643_s3 + $0x38] sm:$0xff]  ;;  %474 = vmatprep.mubr.msk.bf16.mxu1 %vm262_vm1, %v505_v15  ;;  %v31_v18 = vld [vmem:[%s643_s3] sm:$0x1]  ;;  %v506_v56 = vld [vmem:[%s642_s2 + $0x8] sm:$0xff]  }
   0xf   :  { %v507_v57 = vld [vmem:[%s642_s2 + $0x10] sm:$0xff]   ;;  %v508_v58 = vld [vmem:[%s642_s2 + $0x18] sm:$0xff]   ;;  %s537_s2 = smov [#allocation2]  }
  0x10   :  { %67 = vperm.xlu1 %488, %v28_v11   ;;  %s414_s24 = sshll.u32 %s537_s2, 4  ;;  %s415_s24 = int_to_ptr.vmem [resolvable:$true] %s414_s24 }
  0x11   :  { %72 = vperm.xlu0 %487, %v29_v13   ;;  %s509_s0 = scalar_lea.vmem %s415_s24, 16  ;;  %s513_s25 = scalar_lea.vmem %s415_s24, 32 }
  0x12   :  { %463 = vmatmul.mubr.msk.bf16.gmra.mrb[4].mxu0 %vm112_vm0, %v504_v12  ;;  %p510_p0 = scmp.ne.s32.totalorder %s415_s24, %s509_s0  ;;  %p514_p1 = scmp.lt.s32.totalorder %s415_s24, %s415_s24 }
  0x13   :  { %p515_p2 = scmp.lt.s32.totalorder %s513_s25, %s509_s0 }
  0x14   :  { %77 = vperm.xlu1 %488, %v30_v14  }
  0x15   :  { %491 = vset.pattern.permute.xlu0 %v535_v17  ;;  %p516_p3 = por %p515_p2, %p514_p1 }
  0x16   :  { %353 = vperm.xlu0 %491, %v24_v8  }
  0x17   :  { %p517_p4 = pnand %p516_p3, %p510_p0 }
  0x18   :  { %489 = vset.pattern.permute.xlu1 %v534_v16 }
  0x19   :  { %215 = vperm.xlu1 %489, %v24_v8  }
  0x1a   :  { %492 = vset.pattern.permute.xlu0 %v534_v16 }
  0x1b   :  { %211 = vperm.xlu0 %492, %v23_v5  }
  0x1d   :  { %219 = vperm.xlu1 %489, %v25_v6  }
  0x1f   :  { %223 = vperm.xlu0 %492, %v26_v9  }
  0x21   :  { %490 = vset.pattern.permute.xlu1 %v535_v17 }
  0x22   :  { %349 = vperm.xlu1 %490, %v23_v5  }
  0x23   :  { %231 = vperm.xlu0 %492, %v28_v11  }
  0x26   :  { %493 = vset.pattern.permute.xlu1 %v534_v16 }
  0x27   :  { %227 = vperm.xlu1 %493, %v27_v10   ;;  %496 = vset.pattern.permute.xlu0 %v535_v17 }
  0x28   :  { %365 = vperm.xlu0 %496, %v27_v10  }
  0x2b   :  { %494 = vset.pattern.permute.xlu1 %v535_v17 }
  0x2c   :  { %357 = vperm.xlu1 %494, %v25_v6   ;;  %373 = vperm.xlu0 %496, %v29_v13  }
  0x30   :  { %361 = vperm.xlu1 %494, %v26_v9   ;;  %498 = vset.pattern.permute.xlu0 %v536_v19 }
  0x31   :  { %403 = vperm.xlu0 %498, %v31_v18  }
  0x34   :  { %495 = vset.pattern.permute.xlu1 %v534_v16 }
  0x35   :  { %235 = vperm.xlu1 %495, %v29_v13  }
  0x39   :  { %239 = vperm.xlu1 %495, %v30_v14  }
  0x3d   :  { %497 = vset.pattern.permute.xlu1 %v535_v17 }
  0x3e   :  { %369 = vperm.xlu1 %497, %v28_v11  }
  0x42   :  { %377 = vperm.xlu1 %497, %v30_v14  }
  0x81   :  { %v53_v21 = vpop.permute.xlu1 %52 }
  0x83   :  { %v43_v20 = vpop.permute.xlu0 %42 }
  0x87   :  { %v48_v22 = vpop.permute.xlu0 %47 }
  0x8b   :  { %v58_v23 = vpop.permute.xlu1 %57 }
  0x8c   :  { %v63_v27 = vpop.permute.xlu0 %62 }
  0x8f   :  { %v68_v32 = vpop.permute.xlu1 %67 }
  0x90   :  { %v73_v39 = vpop.permute.xlu0 %72 }
  0x93   :  { %v78_v44 = vpop.permute.xlu1 %77 }
  0x95   :  { %v354_v63 = vpop.permute.xlu0 %353 }
  0x98   :  { %v216_v59 = vpop.permute.xlu1 %215 }
  0x9a   :  { %v212_v1 = vpop.permute.xlu0 %211 }
  0x9c   :  { %v220_v60 = vpop.permute.xlu1 %219 }
  0x9e   :  { %v224_v3 = vpop.permute.xlu0 %223 }
  0xa1   :  { %v350_v61 = vpop.permute.xlu1 %349 }
  0xa2   :  { %v232_v14 = vpop.permute.xlu0 %231 }
  0xa6   :  { %v228_v62 = vpop.permute.xlu1 %227 }
  0xab   :  { %v358_v0 = vpop.permute.xlu1 %357 }
  0xaf   :  { %v362_v2 = vpop.permute.xlu1 %361 }
  0xb4   :  { %v236_v4 = vpop.permute.xlu1 %235 }
  0xb8   :  { %v240_v15 = vpop.permute.xlu1 %239 }
  0xdd   :  { %v460_v24 = vpop.f32.mrb[0].mxu0 }
  0xde   :  { %v168_v25 = vadd.f32 %v460_v24, %v53_v21  ;;  %v159_v26 = vpop.f32.mrb[1].mxu0 }
  0xdf   :  { %v160_v28 = vadd.f32 %v159_v26, %v43_v20  ;;  %v461_v29 = vpop.f32.mrb[2].mxu0 }
  0xe0   :  { %v171_v30 = vadd.f32 %v461_v29, %v58_v23  ;;  %v162_v31 = vpop.f32.mrb[3].mxu0  ;;  %v192_v34 = vmax.f32 %v168_v25, 0.0 }
  0xe1   :  { %v163_v33 = vadd.f32 %v162_v31, %v48_v22  ;;  %v190_v36 = vmax.f32 %v160_v28, 0.0  ;;  %v366_v22 = vpop.permute.xlu0 %365 }
  0xe2   :  { %v193_v35 = vmax.f32 %v171_v30, 0.0  ;;  %v370_v30 = vpop.permute.xlu1 %369 }
  0xe3   :  { %v191_v37 = vmax.f32 %v163_v33, 0.0 }
  0xe4   :  { %v207_v38 = vpack.c.bf16 %v193_v35, %v192_v34 }
  0xe5   :  { %v464_v40 = vpop.f32.mrb[4].mxu0  ;;  %v206_v41 = vpack.c.bf16 %v191_v37, %v190_v36 }
  0xe6   :  { %v184_v42 = vadd.f32 %v464_v40, %v73_v39  ;;  %v175_v43 = vpop.f32.mrb[5].mxu0  ;;  %v374_v40 = vpop.permute.xlu0 %373 }
  0xe7   :  { %v176_v45 = vadd.f32 %v175_v43, %v63_v27  ;;  %v465_v46 = vpop.f32.mrb[6].mxu0  ;;  %466 = vmatprep.subr.bf16.mxu1 %v206_v41 }
  0xe8   :  { %v187_v47 = vadd.f32 %v465_v46, %v78_v44  ;;  %v178_v48 = vpop.f32.mrb[7].mxu0  ;;  %467 = vmatpush3.bf16.msra.mxu1 %v206_v41  ;;  %v196_v50 = vmax.f32 %v184_v42, 0.0  ;;  %v378_v44 = vpop.permute.xlu1 %377 }
  0xe9   :  { %v179_v49 = vadd.f32 %v178_v48, %v68_v32  ;;  %468 = vmatprep.subr.bf16.mxu1 %v207_v38  ;;  %v194_v52 = vmax.f32 %v176_v45, 0.0 }
  0xea   :  { %v197_v51 = vmax.f32 %v187_v47, 0.0 }
  0xeb   :  { %v195_v53 = vmax.f32 %v179_v49, 0.0 }
  0xec   :  { %v209_v54 = vpack.c.bf16 %v197_v51, %v196_v50  ;;  %469 = vmatpush3.bf16.msra.mxu1 %v207_v38 }
  0xed   :  { %v208_v55 = vpack.c.bf16 %v195_v53, %v194_v52 }
  0xef   :  { %470 = vmatprep.subr.bf16.mxu1 %v208_v55 }
  0xf0   :  { %471 = vmatpush3.bf16.msra.mxu1 %v208_v55  ;;  %v404_v55 = vpop.permute.xlu0 %403 }
  0xf1   :  { %472 = vmatprep.subr.bf16.mxu1 %v209_v54 }
  0xf4   :  { %473 = vmatpush3.bf16.msra.mxu1 %v209_v54 }
  0xf7   :  { %475 = vmatmul.mubr.msk.bf16.vlgmr.msra.gmra.mrb[0].mxu1 %vm262_vm1, %v506_v56 }
  0xf8   :  { %478 = vmatprep.mubr.msk.bf16.mxu1 %vm262_vm1, %v507_v57 }
  0xff   :  { %479 = vmatmul.mubr.msk.bf16.gmra.mrb[4].mxu1 %vm262_vm1, %v508_v58 }
 0x1ca   :  { %v476_v5 = vpop.f32.mrb[0].mxu1 }
 0x1cb   :  { %v309_v6 = vpop.f32.mrb[1].mxu1  ;;  %v318_v7 = vadd.f32 %v476_v5, %v220_v60 }
 0x1cc   :  { %v310_v8 = vadd.f32 %v309_v6, %v212_v1  ;;  %v477_v9 = vpop.f32.mrb[2].mxu1 }
 0x1cd   :  { %v321_v10 = vadd.f32 %v477_v9, %v224_v3  ;;  %v312_v11 = vpop.f32.mrb[3].mxu1  ;;  %v342_v16 = vmax.f32 %v318_v7, 0.0 }
 0x1ce   :  { %v340_v12 = vmax.f32 %v310_v8, 0.0  ;;  %v313_v13 = vadd.f32 %v312_v11, %v216_v59 }
 0x1cf   :  { %v343_v18 = vmax.f32 %v321_v10, 0.0  ;;  %v382_v24 = vmul.f32 %v358_v0, %v342_v16 }
 0x1d0   :  { %v341_v17 = vmax.f32 %v313_v13, 0.0  ;;  %v380_v19 = vmul.f32 %v350_v61, %v340_v12 }
 0x1d1   :  { %v383_v29 = vmul.f32 %v362_v2, %v343_v18 }
 0x1d2   :  { %v381_v20 = vmul.f32 %v354_v63, %v341_v17  ;;  %v480_v21 = vpop.f32.mrb[4].mxu1 }
 0x1d3   :  { %v325_v23 = vpop.f32.mrb[5].mxu1  ;;  %v334_v26 = vadd.f32 %v480_v21, %v236_v4 }
 0x1d4   :  { %v388_v25 = vadd.f32 %v381_v20, %v380_v19  ;;  %v326_v27 = vadd.f32 %v325_v23, %v228_v62  ;;  %v481_v28 = vpop.f32.mrb[6].mxu1 }
 0x1d5   :  { %v328_v31 = vpop.f32.mrb[7].mxu1  ;;  %v337_v34 = vadd.f32 %v481_v28, %v240_v15  ;;  %v346_v36 = vmax.f32 %v334_v26, 0.0 }
 0x1d6   :  { %v389_v32 = vadd.f32 %v388_v25, %v382_v24  ;;  %v344_v33 = vmax.f32 %v326_v27, 0.0  ;;  %v329_v35 = vadd.f32 %v328_v31, %v232_v14 }
 0x1d7   :  { %v347_v42 = vmax.f32 %v337_v34, 0.0  ;;  %v386_v45 = vmul.f32 %v374_v40, %v346_v36 }
 0x1d8   :  { %v384_v37 = vmul.f32 %v366_v22, %v344_v33  ;;  %v390_v38 = vadd.f32 %v389_v32, %v383_v29  ;;  %v345_v39 = vmax.f32 %v329_v35, 0.0 }
 0x1d9   :  { %v387_v48 = vmul.f32 %v378_v44, %v347_v42 }
 0x1da   :  { %v391_v41 = vadd.f32 %v390_v38, %v384_v37  ;;  %v385_v43 = vmul.f32 %v370_v30, %v345_v39 }
 0x1dc   :  { %v392_v46 = vadd.f32 %v391_v41, %v385_v43 }
 0x1de   :  { %v393_v47 = vadd.f32 %v392_v46, %v386_v45 }
 0x1e0   :  { %v394_v49 = vadd.f32 %v393_v47, %v387_v48 }
 0x1e2   :  { %v395_v50 = vrot.slane %v394_v49, 4 }
 0x1e4   :  { %v396_v51 = vadd.f32 %v395_v50, %v394_v49 }
 0x1e6   :  { %v397_v52 = vrot.slane %v396_v51, 2 }
 0x1e8   :  { %v398_v53 = vadd.f32 %v397_v52, %v396_v51 }
 0x1ea   :  { %v399_v54 = vrot.slane %v398_v53, 1 }
 0x1ec   :  { %v400_v56 = vadd.f32 %v399_v54, %v398_v53 }
 0x1ee   :  { %v406_v57 = vadd.f32 %v404_v55, %v400_v56 }
 0x1f0   :  { %407 = vst [vmem:[#allocation2] sm:$0x1] %v406_v57 }
 0x1f1   :  { %520 = shalt.err (!%p517_p4)
}
 0x1f2   :  { %s521_s28 = scalar_lea.hbm %s644_s4, 16 }
 0x1f3   :  { %p522_p5 = scmp.ne.s32.totalorder %s644_s4, %s521_s28  ;;  %p525_p6 = scmp.lt.u32.totalorder %s521_s28, %s644_s4 }
 0x1f5   :  { %p527_p7 = pnand %p525_p6, %p522_p5 }
 0x1f7   :  { %530 = shalt.err (!%p527_p7)
}
 0x1f8   :  { %417 = dma.vmem_to_hbm [thread:$0]  %s415_s24, 16, %s644_s4, [#allocation3]  }
 0x1f9   :  { %531 = dma.done.wait [#allocation3], 16  }
 0x1fa   :  { %532 = vsyncadd [#allocation3], 4294967280 }
 0x1fb   :  { %421 = vsyncpa [#allocation3], 1 }

</bundles_post_ra>
